<compile_context>
chip_gen: v7x
topology: tpu7x:2x2x1
jax: 0.10.0
libtpu: 0.0.40
codegen_flags: <defaults>
</compile_context>

<pallas_src>
import functools

import jax
import jax.numpy as jnp
from jax.experimental import pallas as pl
from jax.experimental.pallas import tpu as pltpu

ALPHA = 0.25          # focal alpha; the kernel's alpha_t = 0.75 - 0.5*t assumes 0.25
GAMMA = 2.0           # focal gamma; the kernel hard-codes (1 - p_t)**2 as q*q
LANE = 128
SUB = 8               # f32 sublane tile height
_NEG_PAD = -1e9       # loss-neutral pad logit (exp flushes to 0 in f32)


@functools.partial(jax.jit, static_argnames=("rows_per_tile",))
def _mask_loss_sums(src_flat, tgt_flat, rows_per_tile=4096):
    """Stream [B, N] f32 logits/targets through the kernel.

    Returns (B, 4) f32 sums: [sum focal, sum sigmoid*t, sum sigmoid, sum t].
    """
    B, N = src_flat.shape

    # Corner-case pads only (loss-neutral).  The common case (N % 128 == 0,
    # N >= 1024) is zero-copy: the reshape below is a free bitcast and the
    # ragged row tail is masked inside the kernel.
    lane_pad = (-N) % LANE
    if lane_pad:
        src_flat = jnp.pad(src_flat, ((0, 0), (0, lane_pad)), constant_values=_NEG_PAD)
        tgt_flat = jnp.pad(tgt_flat, ((0, 0), (0, lane_pad)), constant_values=0.0)
    R = (N + lane_pad) // LANE

    src3 = src_flat.reshape(B, R, LANE)
    tgt3 = tgt_flat.reshape(B, R, LANE)
    if R < SUB:  # tiny inputs only
        row_pad = SUB - R
        src3 = jnp.pad(src3, ((0, 0), (0, row_pad), (0, 0)), constant_values=_NEG_PAD)
        tgt3 = jnp.pad(tgt3, ((0, 0), (0, row_pad), (0, 0)), constant_values=0.0)
        R = SUB

    rpt = min(rows_per_tile, (R // SUB) * SUB)   # rows per tile (multiple of 8)
    k = -(-R // rpt)                             # reduction steps
    tail_rows = R - (k - 1) * rpt                # valid rows in the last tile (1..rpt)

    def kernel(x_ref, t_ref, out_ref):
        j = pl.program_id(1)

        @pl.when(j == 0)
        def _init():
            out_ref[...] = jnp.zeros_like(out_ref)

        def accum(x, t):
            # One exp + one log1p + one EUP reciprocal per element.
            e = jnp.exp(-jnp.abs(x))
            inv = pl.reciprocal(1.0 + e, approx=True)
            prob = jnp.where(x >= 0.0, inv, e * inv)             # sigmoid(x)
            ce = jnp.maximum(x, 0.0) - x * t + jnp.log1p(e)      # BCE with logits
            pt = prob * t                                        # reused by dice
            q = (prob + t) - 2.0 * pt                            # 1 - p_t
            alpha_t = 0.75 - 0.5 * t                             # ALPHA = 0.25
            focal = (alpha_t * ce) * (q * q)                     # GAMMA = 2
            # (8,128)-granular accumulation into the resident output block:
            # pure VALU adds, aligned full-vreg stores, no XLU per step.
            out_ref[0:SUB, :] += jnp.sum(focal.reshape(-1, SUB, LANE), axis=0)
            out_ref[SUB:2 * SUB, :] += jnp.sum(pt.reshape(-1, SUB, LANE), axis=0)
            out_ref[2 * SUB:3 * SUB, :] += jnp.sum(prob.reshape(-1, SUB, LANE), axis=0)
            out_ref[3 * SUB:4 * SUB, :] += jnp.sum(t.reshape(-1, SUB, LANE), axis=0)

        if tail_rows == rpt:
            # No ragged tail: single lean path, no masking anywhere.
            accum(x_ref[...], t_ref[...])
        else:
            @pl.when(j != k - 1)
            def _body():
                accum(x_ref[...], t_ref[...])

            @pl.when(j == k - 1)
            def _tail():
                # The last block overhangs the array; its overhang rows hold
                # unspecified data.  Replace them with loss-neutral values.
                # tail_rows is static, so the mask is a compile-time constant.
                rows = jax.lax.broadcasted_iota(jnp.int32, (rpt, LANE), 0)
                valid = rows < tail_rows
                accum(jnp.where(valid, x_ref[...], _NEG_PAD),
                      jnp.where(valid, t_ref[...], 0.0))

    total = B * R * LANE
    cost = pl.CostEstimate(
        flops=22 * total,
        transcendentals=3 * total,
        bytes_accessed=2 * total * 4 + B * 4 * SUB * LANE * 4,
    )

    out = pl.pallas_call(
        kernel,
        out_shape=jax.ShapeDtypeStruct((B, 4 * SUB, LANE), jnp.float32),
        grid_spec=pltpu.PrefetchScalarGridSpec(
            num_scalar_prefetch=0,
            grid=(B, k),
            in_specs=[
                pl.BlockSpec((None, rpt, LANE), lambda b, j: (b, j, 0)),
                pl.BlockSpec((None, rpt, LANE), lambda b, j: (b, j, 0)),
            ],
            out_specs=pl.BlockSpec((None, 4 * SUB, LANE), lambda b, j: (b, 0, 0)),
        ),
        compiler_params=pltpu.CompilerParams(
            dimension_semantics=("parallel", "arbitrary"),
            # 8 MiB double-buffered inputs + elementwise temporaries; fits
            # comfortably under v7x's 64 MiB physical VMEM per TC.
            vmem_limit_bytes=48 * 1024 * 1024,
        ),
        cost_estimate=cost,
    )(src3, tgt3)

    # Tiny cross-sublane / cross-lane reduce in plain JAX.
    return out.reshape(B, 4, SUB, LANE).sum(axis=(2, 3))   # (B, 4)


def _focal_dice_from_sums(acc, n_elems):
    """focal = mean(1).sum(); dice = sum(1 - (2*inter + 1) / (den + 1))."""
    focal = jnp.sum(acc[:, 0] / jnp.float32(n_elems))
    dice = jnp.sum(1.0 - (2.0 * acc[:, 1] + 1.0) / (acc[:, 2] + acc[:, 3] + 1.0))
    return focal, dice


class SetCriterion:
    """JAX/Pallas port of the PyTorch SetCriterion (mask losses only)."""

    def __init__(self, aux_loss=0, aux_loss_norm=0):
        self.num_classes = 1
        self.aux_loss = aux_loss
        self.aux_loss_norm = aux_loss_norm != 0

    def loss_masks(self, outputs, targets):
        assert 'pred_masks' in outputs
        src_masks = outputs['pred_masks']                         # [B, T, H, W]
        target_masks = jnp.stack([t['masks'] for t in targets], axis=0)

        B = src_masks.shape[0]
        src_flat = src_masks.reshape(B, -1)
        tgt_flat = target_masks.reshape(B, -1)
        # Stream f32 straight into the kernel: a standalone wrapper-side cast
        # would be a full extra HBM pass.
        if src_flat.dtype != jnp.float32:
            # TODO(synk): accept bf16 logits natively (needs 16-row sublane tiles).
            src_flat = src_flat.astype(jnp.float32)
        if tgt_flat.dtype != jnp.float32:
            tgt_flat = tgt_flat.astype(jnp.float32)
        N = src_flat.shape[1]

        acc = _mask_loss_sums(src_flat, tgt_flat)
        focal_loss_, dice_loss_ = _focal_dice_from_sums(acc, N)

        if 'aux_pred_masks' in outputs and self.aux_loss > 0:
            aux_predictions = outputs['aux_pred_masks']
            if not isinstance(aux_predictions, list):
                aux_predictions = [aux_predictions]
            if self.aux_loss_norm:
                w_main = 1.0 / (1.0 + self.aux_loss)
                w_aux = self.aux_loss / (1.0 + self.aux_loss)
            else:
                w_main = 1.0
                w_aux = self.aux_loss
            focal_loss_ = focal_loss_ * w_main
            dice_loss_ = dice_loss_ * w_main
            # TODO(synk): fuse aux heads into one pallas_call (head axis
            # innermost, target index_map ignoring it) so the target tile is
            # not re-streamed per head.
            for aux_pred in aux_predictions:
                aux_flat = aux_pred.reshape(aux_pred.shape[0], -1)
                if aux_flat.dtype != jnp.float32:
                    aux_flat = aux_flat.astype(jnp.float32)
                aux_acc = _mask_loss_sums(aux_flat, tgt_flat)
                aux_focal, aux_dice = _focal_dice_from_sums(aux_acc, N)
                focal_loss_ = focal_loss_ + aux_focal * w_aux
                dice_loss_ = dice_loss_ + aux_dice * w_aux

        return {'loss_mask': focal_loss_, 'loss_dice': dice_loss_}

    def __call__(self, outputs, targets):
        losses = {}
        losses.update(self.loss_masks(outputs, targets))
        return losses


# ---------------- plain-JAX reference (correctness sanity check) -------------
def _ref_losses(src, tgt):
    B = src.shape[0]
    x = src.reshape(B, -1).astype(jnp.float32)
    t = tgt.reshape(B, -1).astype(jnp.float32)
    p = jax.nn.sigmoid(x)
    ce = jnp.maximum(x, 0.0) - x * t + jnp.log1p(jnp.exp(-jnp.abs(x)))
    p_t = p * t + (1 - p) * (1 - t)
    focal = (ALPHA * t + (1 - ALPHA) * (1 - t)) * ce * (1 - p_t) ** GAMMA
    focal_loss = jnp.sum(jnp.mean(focal, axis=1))
    num = 2 * jnp.sum(p * t, axis=1)
    den = jnp.sum(p, axis=1) + jnp.sum(t, axis=1)
    dice = jnp.sum(1 - (num + 1) / (den + 1))
    return focal_loss, dice


if __name__ == "__main__":
    key = jax.random.PRNGKey(0)
    keys = jax.random.split(key, 4)

    def run_case(B, T, H, W, k_pred, k_tgt):
        pred_masks = jax.random.normal(k_pred, (B, T, H, W), dtype=jnp.float32)
        tgt_bits = (jax.random.uniform(k_tgt, (B, T, H, W)) > 0.5).astype(jnp.float32)

        outputs = {'pred_masks': pred_masks}
        targets = [{'masks': tgt_bits[b]} for b in range(B)]

        criterion = SetCriterion(aux_loss=0, aux_loss_norm=0)
        losses = criterion(outputs, targets)
        jax.block_until_ready(losses)

        ref_focal, ref_dice = _ref_losses(pred_masks, tgt_bits)
        # approx=True EUP reciprocal has ~2^-12 relative error -> 5e-3 tol.
        assert jnp.allclose(losses['loss_mask'], ref_focal, rtol=5e-3, atol=5e-3), \
            (losses['loss_mask'], ref_focal)
        assert jnp.allclose(losses['loss_dice'], ref_dice, rtol=5e-3, atol=5e-3), \
            (losses['loss_dice'], ref_dice)

    # N = 1024: zero-copy path, no in-kernel tail mask.
    run_case(2, 4, 16, 16, keys[0], keys[1])
    # N = 1200: exercises the lane pad and the in-kernel ragged-tail mask.
    run_case(2, 3, 20, 20, keys[2], keys[3])

    print("KERNEL_OK")
</pallas_src>

<mosaic_0001>
module attributes {stable_mosaic.version = 11 : i64} {
  func.func @kernel(%arg0: i32, %arg1: i32, %arg2: memref<1x8x128xf32, #tpu.memory_space<vmem>>, %arg3: memref<1x8x128xf32, #tpu.memory_space<vmem>>, %arg4: memref<1x32x128xf32, #tpu.memory_space<vmem>>) attributes {dimension_semantics = [#tpu.dimension_semantics<parallel>, #tpu.dimension_semantics<arbitrary>], iteration_bounds = array<i64: 2, 1>, scalar_prefetch = 0 : i64, scratch_operands = 0 : i64, tpu.core_type = #tpu.core_type<tc>, window_params = [{transform_indices = @transform_0, window_bounds = array<i64: 1, 8, 128>}, {transform_indices = @transform_1, window_bounds = array<i64: 1, 8, 128>}, {transform_indices = @transform_2, window_bounds = array<i64: 1, 32, 128>}]} {
    %c0_i32 = arith.constant 0 : i32
    %0 = arith.cmpi eq, %arg1, %c0_i32 : i32
    %1 = arith.extui %0 : i1 to i32
    %c0_i32_0 = arith.constant 0 : i32
    %2 = arith.cmpi ne, %1, %c0_i32_0 : i32
    scf.if %2 {
      %cst_37 = arith.constant 0.000000e+00 : f32
      %68 = vector.broadcast %cst_37 : f32 to vector<32x128xf32>
      %c0_38 = arith.constant 0 : index
      %c0_39 = arith.constant 0 : index
      %c0_40 = arith.constant 0 : index
      %69 = vector.load %arg4[%c0_38, %c0_39, %c0_40] : memref<1x32x128xf32, #tpu.memory_space<vmem>>, vector<1x32x128xf32>
      %70 = vector.shape_cast %69 : vector<1x32x128xf32> to vector<32x128xf32>
      %71 = vector.shape_cast %68 : vector<32x128xf32> to vector<1x32x128xf32>
      tpu.vector_store %arg4[%c0_38, %c0_39, %c0_40], %71 {strides = array<i32>} : memref<1x32x128xf32, #tpu.memory_space<vmem>>, vector<1x32x128xf32>,
    } else {
    }
    %c0 = arith.constant 0 : index
    %c0_1 = arith.constant 0 : index
    %c0_2 = arith.constant 0 : index
    %3 = vector.load %arg2[%c0, %c0_1, %c0_2] : memref<1x8x128xf32, #tpu.memory_space<vmem>>, vector<1x8x128xf32>
    %4 = vector.shape_cast %3 : vector<1x8x128xf32> to vector<8x128xf32>
    %c0_3 = arith.constant 0 : index
    %c0_4 = arith.constant 0 : index
    %c0_5 = arith.constant 0 : index
    %5 = vector.load %arg3[%c0_3, %c0_4, %c0_5] : memref<1x8x128xf32, #tpu.memory_space<vmem>>, vector<1x8x128xf32>
    %6 = vector.shape_cast %5 : vector<1x8x128xf32> to vector<8x128xf32>
    %7 = math.absf %4 : vector<8x128xf32>
    %cst = arith.constant 0.000000e+00 : f32
    %8 = vector.broadcast %cst : f32 to vector<8x128xf32>
    %9 = arith.subf %8, %7 : vector<8x128xf32>
    %10 = math.exp %9 : vector<8x128xf32>
    %cst_6 = arith.constant 1.000000e+00 : f32
    %11 = vector.broadcast %cst_6 : f32 to vector<8x128xf32>
    %12 = arith.addf %11, %10 : vector<8x128xf32>
    %13 = tpu.reciprocal %12 {approx = true} : vector<8x128xf32> -> vector<8x128xf32>
    %cst_7 = arith.constant 0.000000e+00 : f32
    %14 = vector.broadcast %cst_7 : f32 to vector<8x128xf32>
    %15 = arith.cmpf oge, %4, %14 : vector<8x128xf32>
    %16 = arith.mulf %10, %13 : vector<8x128xf32>
    %17 = arith.select %15, %13, %16 : vector<8x128xi1>, vector<8x128xf32>
    %cst_8 = arith.constant 0.000000e+00 : f32
    %18 = vector.broadcast %cst_8 : f32 to vector<8x128xf32>
    %19 = arith.maximumf %4, %18 : vector<8x128xf32>
    %20 = arith.mulf %4, %6 : vector<8x128xf32>
    %21 = arith.subf %19, %20 : vector<8x128xf32>
    %22 = math.log1p %10 : vector<8x128xf32>
    %23 = arith.addf %21, %22 : vector<8x128xf32>
    %24 = arith.mulf %17, %6 : vector<8x128xf32>
    %25 = arith.addf %17, %6 : vector<8x128xf32>
    %cst_9 = arith.constant 2.000000e+00 : f32
    %26 = vector.broadcast %cst_9 : f32 to vector<8x128xf32>
    %27 = arith.mulf %26, %24 : vector<8x128xf32>
    %28 = arith.subf %25, %27 : vector<8x128xf32>
    %cst_10 = arith.constant 5.000000e-01 : f32
    %29 = vector.broadcast %cst_10 : f32 to vector<8x128xf32>
    %30 = arith.mulf %29, %6 : vector<8x128xf32>
    %cst_11 = arith.constant 7.500000e-01 : f32
    %31 = vector.broadcast %cst_11 : f32 to vector<8x128xf32>
    %32 = arith.subf %31, %30 : vector<8x128xf32>
    %33 = arith.mulf %32, %23 : vector<8x128xf32>
    %34 = arith.mulf %28, %28 : vector<8x128xf32>
    %35 = arith.mulf %33, %34 : vector<8x128xf32>
    %c0_12 = arith.constant 0 : index
    %c0_13 = arith.constant 0 : index
    %c0_14 = arith.constant 0 : index
    %36 = vector.load %arg4[%c0_12, %c0_13, %c0_14] : memref<1x32x128xf32, #tpu.memory_space<vmem>>, vector<1x8x128xf32>
    %37 = vector.shape_cast %36 : vector<1x8x128xf32> to vector<8x128xf32>
    %38 = vector.shape_cast %35 : vector<8x128xf32> to vector<1x8x128xf32>
    %cst_15 = arith.constant dense<0.000000e+00> : vector<8x128xf32>
    %39 = vector.multi_reduction <add>, %38, %cst_15 [0] : vector<1x8x128xf32> to vector<8x128xf32>
    %40 = arith.addf %37, %39 : vector<8x128xf32>
    %c0_16 = arith.constant 0 : index
    %c0_17 = arith.constant 0 : index
    %c0_18 = arith.constant 0 : index
    %41 = vector.load %arg4[%c0_16, %c0_17, %c0_18] : memref<1x32x128xf32, #tpu.memory_space<vmem>>, vector<1x8x128xf32>
    %42 = vector.shape_cast %41 : vector<1x8x128xf32> to vector<8x128xf32>
    %43 = vector.shape_cast %40 : vector<8x128xf32> to vector<1x8x128xf32>
    tpu.vector_store %arg4[%c0_16, %c0_17, %c0_18], %43 {strides = array<i32>} : memref<1x32x128xf32, #tpu.memory_space<vmem>>, vector<1x8x128xf32>,
    %c0_19 = arith.constant 0 : index
    %c8 = arith.constant 8 : index
    %c0_20 = arith.constant 0 : index
    %44 = vector.load %arg4[%c0_19, %c8, %c0_20] : memref<1x32x128xf32, #tpu.memory_space<vmem>>, vector<1x8x128xf32>
    %45 = vector.shape_cast %44 : vector<1x8x128xf32> to vector<8x128xf32>
    %46 = vector.shape_cast %24 : vector<8x128xf32> to vector<1x8x128xf32>
    %cst_21 = arith.constant dense<0.000000e+00> : vector<8x128xf32>
    %47 = vector.multi_reduction <add>, %46, %cst_21 [0] : vector<1x8x128xf32> to vector<8x128xf32>
    %48 = arith.addf %45, %47 : vector<8x128xf32>
    %c0_22 = arith.constant 0 : index
    %c8_23 = arith.constant 8 : index
    %c0_24 = arith.constant 0 : index
    %49 = vector.load %arg4[%c0_22, %c8_23, %c0_24] : memref<1x32x128xf32, #tpu.memory_space<vmem>>, vector<1x8x128xf32>
    %50 = vector.shape_cast %49 : vector<1x8x128xf32> to vector<8x128xf32>
    %51 = vector.shape_cast %48 : vector<8x128xf32> to vector<1x8x128xf32>
    tpu.vector_store %arg4[%c0_22, %c8_23, %c0_24], %51 {strides = array<i32>} : memref<1x32x128xf32, #tpu.memory_space<vmem>>, vector<1x8x128xf32>,
    %c0_25 = arith.constant 0 : index
    %c16 = arith.constant 16 : index
    %c0_26 = arith.constant 0 : index
    %52 = vector.load %arg4[%c0_25, %c16, %c0_26] : memref<1x32x128xf32, #tpu.memory_space<vmem>>, vector<1x8x128xf32>
    %53 = vector.shape_cast %52 : vector<1x8x128xf32> to vector<8x128xf32>
    %54 = vector.shape_cast %17 : vector<8x128xf32> to vector<1x8x128xf32>
    %cst_27 = arith.constant dense<0.000000e+00> : vector<8x128xf32>
    %55 = vector.multi_reduction <add>, %54, %cst_27 [0] : vector<1x8x128xf32> to vector<8x128xf32>
    %56 = arith.addf %53, %55 : vector<8x128xf32>
    %c0_28 = arith.constant 0 : index
    %c16_29 = arith.constant 16 : index
    %c0_30 = arith.constant 0 : index
    %57 = vector.load %arg4[%c0_28, %c16_29, %c0_30] : memref<1x32x128xf32, #tpu.memory_space<vmem>>, vector<1x8x128xf32>
    %58 = vector.shape_cast %57 : vector<1x8x128xf32> to vector<8x128xf32>
    %59 = vector.shape_cast %56 : vector<8x128xf32> to vector<1x8x128xf32>
    tpu.vector_store %arg4[%c0_28, %c16_29, %c0_30], %59 {strides = array<i32>} : memref<1x32x128xf32, #tpu.memory_space<vmem>>, vector<1x8x128xf32>,
    %c0_31 = arith.constant 0 : index
    %c24 = arith.constant 24 : index
    %c0_32 = arith.constant 0 : index
    %60 = vector.load %arg4[%c0_31, %c24, %c0_32] : memref<1x32x128xf32, #tpu.memory_space<vmem>>, vector<1x8x128xf32>
    %61 = vector.shape_cast %60 : vector<1x8x128xf32> to vector<8x128xf32>
    %62 = vector.shape_cast %6 : vector<8x128xf32> to vector<1x8x128xf32>
    %cst_33 = arith.constant dense<0.000000e+00> : vector<8x128xf32>
    %63 = vector.multi_reduction <add>, %62, %cst_33 [0] : vector<1x8x128xf32> to vector<8x128xf32>
    %64 = arith.addf %61, %63 : vector<8x128xf32>
    %c0_34 = arith.constant 0 : index
    %c24_35 = arith.constant 24 : index
    %c0_36 = arith.constant 0 : index
    %65 = vector.load %arg4[%c0_34, %c24_35, %c0_36] : memref<1x32x128xf32, #tpu.memory_space<vmem>>, vector<1x8x128xf32>
    %66 = vector.shape_cast %65 : vector<1x8x128xf32> to vector<8x128xf32>
    %67 = vector.shape_cast %64 : vector<8x128xf32> to vector<1x8x128xf32>
    tpu.vector_store %arg4[%c0_34, %c24_35, %c0_36], %67 {strides = array<i32>} : memref<1x32x128xf32, #tpu.memory_space<vmem>>, vector<1x8x128xf32>,
    return
  }
  func.func @transform_0(%arg0: i32, %arg1: i32) -> (i32, i32, i32) {
    %c0_i32 = arith.constant 0 : i32
    %c0_i32_0 = arith.constant 0 : i32
    return %arg0, %arg1, %c0_i32 : i32, i32, i32
  }
  func.func @transform_1(%arg0: i32, %arg1: i32) -> (i32, i32, i32) {
    %c0_i32 = arith.constant 0 : i32
    %c0_i32_0 = arith.constant 0 : i32
    return %arg0, %arg1, %c0_i32 : i32, i32, i32
  }
  func.func @transform_2(%arg0: i32, %arg1: i32) -> (i32, i32, i32) {
    %c0_i32 = arith.constant 0 : i32
    %c0_i32_0 = arith.constant 0 : i32
    %c0_i32_1 = arith.constant 0 : i32
    return %arg0, %c0_i32, %c0_i32_0 : i32, i32, i32
  }
}

</mosaic_0001>

<bundles_post_ra>
// kernel: _mask_loss_sums.1
= control target key start
LH: loop header
LB: loop body
LE: loop exit
PB: predicated region body
PF: predicated region fallthrough
CT: control target
= control target key end

     0   :  { %s412_s9 = smov 0   ;;  %s414_s10 = smov 0   ;;  %s454_s0 = inlined_call_operand.vmem [shape: f32[2,8,128], index: 0, kind: input, shape index: {}]   ;;  %s455_s1 = inlined_call_operand.vmem [shape: f32[2,8,128], index: 1, kind: input, shape index: {}]   ;;  %s456_s2 = inlined_call_operand.vmem [shape: f32[2,32,128], index: 2, kind: output, shape index: {}]  }
   0x1   :  { %s416_s11 = smov 0  }
   0x2 LB: > { %s24_s12 = sadd.s32 1, %s391_s10  ;;  %p334_p0 = scmp.ge.s32.totalorder %s395_s11, 1  ;;  %s395_s11 = sphi %s416_s11, %s12_s11   ;;  %s391_s10 = sphi %s414_s10, %s458_s10   ;;  %s387_s9 = sphi %s412_s9, %s457_s9  }
   0x3   : > { %p26_p1 = scmp.ge.s32.totalorder %s24_s12, 2  ;;  %p142_p2 = scmp.lt.s32.totalorder %s395_s11, 3 }
   0x5   : > { %s460_s12 = smov (%p26_p1, %s24_s12), 0  ;;  %p143_p3 = pnand %p334_p0, %p142_p2 }
   0x6   : > { %p173_p4 = scmp.lt.s32.totalorder (!%p143_p3), %s387_s9, 1 }
   0x7   : > { %146 = sbr.rel (%p143_p3) target bundleno = 62 (0x3e), region = 28 }
   0xe   : > { %s462_s9 = smov (!%p173_p4, %s387_s9), 1 }
   0xf   : > { %s341_s13 = sshll.u32 %s462_s9, 5  ;;  %s335_s14 = sshll.u32 %s462_s9, 3 }
  0x10   : > { %s179_s17 = scalar_lea.vmem %s454_s0, %s335_s14  ;;  %s186_s20 = scalar_lea.vmem %s455_s1, %s335_s14 }
  0x11   : > { %v200_v0 = vld [vmem:[%s179_s17] sm:$0xff]  ;;  %s439_s23 = scalar_lea.vmem %s456_s2, %s341_s13 }
  0x12   : > { %v201_v1 = vld [vmem:[%s186_s20] sm:$0xff]  ;;  %v202_v2 = vand.u32 2147483647, %v200_v0  ;;  %v211_v9 = vmax.f32 %v200_v0, 0.0  ;;  %vm208_vm0 = vcmp.ge.f32.partialorder %v200_v0, 0.0 }
  0x13   : > { %248 = vst [vmem:[%s439_s23 + $0x18] sm:$0xff] %v201_v1  ;;  %v212_v10 = vmul.f32 %v201_v1, %v200_v0  ;;  %v228_v12 = vmul.f32 0.5, %v201_v1 }
  0x14   : > { %v203_v3 = vsub.f32 0.0, %v202_v2 }
  0x15   : > { %v213_v17 = vsub.f32 %v211_v9, %v212_v10  ;;  %v229_v20 = vsub.f32 0.75, %v228_v12 }
  0x16   : > { %v204_v4 = vmul.f32 1.442695, %v203_v3 }
  0x18   : > { %367 = vpow2.f32 %v204_v4 }
  0x22   : > { %v368_v5 = vpop.eup %367 }
  0x23   : > { %v206_v6 = vadd.f32 1.0, %v368_v5  ;;  %v217_v7 = vmul.f32 -0.5, %v368_v5  ;;  %v220_v11 = vand.u32 2147483647, %v368_v5 }
  0x25   : > { %369 = vrcp.f32 %v206_v6  ;;  %v218_v8 = vadd.f32 1.0, %v217_v7  ;;  %vm221_vm1 = vcmp.lt.f32.partialorder %v220_v11, 0.0004427343 }
  0x26   : > { %371 = vlog2.f32 %v206_v6 }
  0x27   : > { %v219_v14 = vmul.f32 %v368_v5, %v218_v8 }
  0x2f   : > { %v370_v13 = vpop.eup %369 }
  0x30   : > { %v372_v15 = vpop.eup %371  ;;  %v209_v16 = vmul.f32 %v370_v13, %v368_v5 }
  0x31   : > { %v216_v18 = vmul.f32 0.6931472, %v372_v15 }
  0x32   : > { %v210_v19 = vsel %vm208_vm0, %v370_v13, %v209_v16 }
  0x33   : > { %v222_v21 = vsel %vm221_vm1, %v219_v14, %v216_v18  ;;  %v224_v22 = vmul.f32 %v210_v19, %v201_v1  ;;  %v225_v23 = vadd.f32 %v210_v19, %v201_v1  ;;  %244 = vst [vmem:[%s439_s23 + $0x10] sm:$0xff] %v210_v19 }
  0x34   : > { %v223_v24 = vadd.f32 %v222_v21, %v213_v17 }
  0x35   : > { %v226_v25 = vmul.f32 2.0, %v224_v22  ;;  %240 = vst [vmem:[%s439_s23 + $0x8] sm:$0xff] %v224_v22 }
  0x36   : > { %v230_v27 = vmul.f32 %v229_v20, %v223_v24 }
  0x37   : > { %v227_v26 = vsub.f32 %v225_v23, %v226_v25 }
  0x39   : > { %v231_v28 = vmul.f32 %v227_v26, %v227_v26 }
  0x3b   : > { %v232_v29 = vmul.f32 %v231_v28, %v230_v27 }
  0x3d   : > { %236 = vst [vmem:[%s439_s23] sm:$0xff] %v232_v29 }
  0x3e PF: > { %s12_s11 = sadd.s32 1, %s395_s11   ;;  %s457_s9 = smov %s391_s10 }
  0x3f   : > { %p9_p5 = scmp.ge.s32.totalorder %s12_s11, 4   ;;  %s458_s10 = smov %s460_s12 }
  0x41   :  { %11 = sbr.rel (!%p9_p5) target bundleno = 2 (0x2), region = 65 }

</bundles_post_ra>
